<compile_context>
chip_gen: v7x
topology: tpu7x:2x2x1
jax: 0.10.0
libtpu: 0.0.40
codegen_flags: <defaults>
</compile_context>

<pallas_src>
import jax
import jax.numpy as jnp
from jax import lax
from jax.experimental import pallas as pl
from jax.experimental.pallas import tpu as pltpu


def _round_up(x, m):
    return (x + m - 1) // m * m


# ----------------------------- kernels --------------------------------------


def _pm_kernel(x_ref, w_ref, shift_ref, o_ref):
    # x:(tm,K) bf16 im2col rows, w:(K,Op) bf16 (BN scale pre-folded),
    # shift:(1,Op) f32.  MXU accumulates in f32; BN shift is the only epilogue.
    acc = jnp.dot(x_ref[...], w_ref[...], preferred_element_type=jnp.float32)
    o_ref[...] = (acc + shift_ref[...]).astype(o_ref.dtype)


def _pm_kernel_ktiled(x_ref, w_ref, shift_ref, o_ref, acc_ref):
    # grid = (M tiles, K tiles); reduction axis last, f32 VMEM accumulator.
    kk = pl.program_id(1)

    @pl.when(kk == 0)
    def _():
        acc_ref[...] = jnp.zeros_like(acc_ref)

    acc_ref[...] += jnp.dot(x_ref[...], w_ref[...],
                            preferred_element_type=jnp.float32)

    @pl.when(kk == pl.num_programs(1) - 1)
    def _():
        o_ref[...] = (acc_ref[...] + shift_ref[...]).astype(o_ref.dtype)


# ----------------------------- helpers ---------------------------------------


def _vmem_capacity_bytes(default=64 * 2**20):
    """Physical VMEM per TensorCore; conservative (v7x-sized) default if the
    hardware query is unavailable."""
    try:
        info = pltpu.get_tpu_info()
    except Exception:  # query unavailable (e.g. interpret mode) -> conservative
        return default
    for name in ("vmem_capacity_bytes", "vmem_bytes", "vmem_size_bytes"):
        v = getattr(info, name, None)
        if v:
            return int(v)
    return default


def _pick_tk(K, tk=None):
    if tk is not None:
        assert K % tk == 0 and (tk == K or tk % 128 == 0), (K, tk)
        return tk
    # Prefer multiples of 256 (v6e/v7x MXU is 2x256x256); 384 only as fallback.
    for cand in (512, 256, 384, 128):
        if K % cand == 0:
            return cand
    return K  # single K step


# ----------------------------- wrapper ---------------------------------------


def patch_merging_forward(x, weight, gamma, beta, running_mean, running_var,
                          *, k, stride, eps=1e-5, tm=4096,
                          compute_dtype=jnp.bfloat16, out_dtype=None,
                          weight_resident_bytes=None,
                          force_k_tiling=False, tk=None,
                          return_nhwc=False):
    """x: (N, C, H, W).  weight: (O, C, k, k).  Returns NCHW (or NHWC)."""
    N, C, H, W = x.shape
    O = weight.shape[0]
    Ho = (H - k) // stride + 1
    Wo = (W - k) // stride + 1
    K = C * k * k
    M = N * Ho * Wo
    out_dtype = compute_dtype if out_dtype is None else out_dtype

    # --- im2col glue (plain JAX).  Cast to bf16 BEFORE the transpose so the
    # HBM-bound rearrangement pass moves half the bytes. --------------------
    Hv, Wv = (Ho - 1) * stride + k, (Wo - 1) * stride + k
    x_valid = x if (Hv == H and Wv == W) else x[:, :, :Hv, :Wv]
    x_valid = x_valid.astype(compute_dtype)
    if stride == k:
        xp = x_valid.reshape(N, C, Ho, k, Wo, k)              # free reshape
        xp = jnp.transpose(xp, (0, 2, 4, 1, 3, 5))            # (N,Ho,Wo,C,k,k)
    else:
        cols = []
        for kh in range(k):
            for kw in range(k):
                cols.append(x_valid[:, :, kh: kh + Ho * stride: stride,
                                    kw: kw + Wo * stride: stride])
        xp = jnp.stack(cols, axis=-1).reshape(N, C, Ho, Wo, k, k)
        xp = jnp.transpose(xp, (0, 2, 3, 1, 4, 5))            # (N,Ho,Wo,C,k,k)
    xm = xp.reshape(M, K)                                      # (M, K) bf16

    # weight (O,C,k,k) -> (K,Op) with BN scale folded; shift kept separate (f32)
    inv_std = gamma / jnp.sqrt(running_var + eps)
    wm = weight.reshape(O, K).T * inv_std[None, :]
    shift = beta - running_mean * inv_std

    # lane-dense output stores: pad O up to a multiple of 128 (not wider)
    Op = _round_up(O, 128)
    if Op != O:
        wm = jnp.pad(wm, ((0, 0), (0, Op - O)))
        shift = jnp.pad(shift, ((0, Op - O),))
    wm = wm.astype(compute_dtype)                              # (K, Op) bf16
    shift = shift.reshape(1, Op).astype(jnp.float32)           # (1, Op) f32

    bpe = jnp.dtype(compute_dtype).itemsize
    obpe = jnp.dtype(out_dtype).itemsize

    # --- generation-aware VMEM sizing (64 MiB/TC v7x, 128 MiB v5e/v6e) ------
    cap = _vmem_capacity_bytes()
    vmem_limit = int(max(min(0.75 * cap, cap - 16 * 2**20), 32 * 2**20))
    budget = max(vmem_limit - 8 * 2**20, 16 * 2**20)           # compiler headroom
    if weight_resident_bytes is None:
        weight_resident_bytes = budget // 3
    use_k_tiling = force_k_tiling or (K * Op * bpe > weight_resident_bytes)
    tk_eff = _pick_tk(K, tk) if use_k_tiling else K

    def _est(tm_):
        e = (2 * tm_ * tk_eff * bpe            # x tile (double-buffered)
             + 2 * tk_eff * Op * bpe           # weight tile
             + 2 * Op * 4                      # shift
             + 2 * tm_ * Op * obpe)            # out tile
        if use_k_tiling:
            e += tm_ * Op * 4                  # f32 accumulator scratch
        return e

    # M tiling: largest multiple-of-8 tile fitting the budget; keep grid_m >= 2
    # so both v7x TensorCores get work ("parallel" M axis); ragged block masked.
    if M <= 8:
        tm_eff = M
    else:
        cap_m = min(tm, M)
        if M >= 16:
            cap_m = min(cap_m, _round_up(pl.cdiv(M, 2), 8))
        tm_eff = max(8, (cap_m // 8) * 8)
        while tm_eff > 8 and _est(tm_eff) > budget:
            tm_eff = max(8, ((tm_eff // 2) // 8) * 8)
    grid_m = pl.cdiv(M, tm_eff)

    if not use_k_tiling:
        grid_spec = pltpu.PrefetchScalarGridSpec(
            num_scalar_prefetch=0,
            grid=(grid_m,),
            in_specs=[
                pl.BlockSpec((tm_eff, K), lambda i: (i, 0)),
                pl.BlockSpec((K, Op), lambda i: (0, 0)),
                pl.BlockSpec((1, Op), lambda i: (0, 0)),
            ],
            out_specs=pl.BlockSpec((tm_eff, Op), lambda i: (i, 0)),
        )
        kernel = _pm_kernel
        dim_sem = ("parallel",)
    else:
        grid_k = K // tk_eff
        grid_spec = pltpu.PrefetchScalarGridSpec(
            num_scalar_prefetch=0,
            grid=(grid_m, grid_k),
            in_specs=[
                pl.BlockSpec((tm_eff, tk_eff), lambda i, kk: (i, kk)),
                pl.BlockSpec((tk_eff, Op), lambda i, kk: (kk, 0)),
                pl.BlockSpec((1, Op), lambda i, kk: (0, 0)),
            ],
            out_specs=pl.BlockSpec((tm_eff, Op), lambda i, kk: (i, 0)),
            scratch_shapes=[pltpu.VMEM((tm_eff, Op), jnp.float32)],
        )
        kernel = _pm_kernel_ktiled
        dim_sem = ("parallel", "arbitrary")

    out = pl.pallas_call(
        kernel,
        out_shape=jax.ShapeDtypeStruct((M, Op), out_dtype),
        grid_spec=grid_spec,
        compiler_params=pltpu.CompilerParams(
            dimension_semantics=dim_sem,
            vmem_limit_bytes=vmem_limit),
    )(xm, wm, shift)

    y = out[:, :O].reshape(N, Ho, Wo, O)                       # drop lane padding
    if return_nhwc:
        return y
    # TODO(synk): for fused NHWC pipelines use return_nhwc=True and skip this
    # extra HBM pass; NCHW kept as the default to match the PyTorch module.
    return jnp.transpose(y, (0, 3, 1, 2))


# ----------------------------- reference & test ------------------------------


def _reference(x, weight, gamma, beta, running_mean, running_var, *, k, stride,
               eps=1e-5):
    y = lax.conv_general_dilated(
        x, weight, window_strides=(stride, stride), padding="VALID",
        dimension_numbers=("NCHW", "OIHW", "NCHW"))
    s = gamma / jnp.sqrt(running_var + eps)
    b = beta - running_mean * s
    return y * s[None, :, None, None] + b[None, :, None, None]


if __name__ == "__main__":
    def _check(N, C, H, W, k, stride, O, **kw):
        key = jax.random.PRNGKey(0)
        kx, kw_, kg, kb, km, kv = jax.random.split(key, 6)
        x = jax.random.normal(kx, (N, C, H, W), dtype=jnp.float32)
        weight = jax.random.normal(kw_, (O, C, k, k), dtype=jnp.float32) * 0.1
        gamma = jax.random.normal(kg, (O,), dtype=jnp.float32) * 0.1 + 1.0
        beta = jax.random.normal(kb, (O,), dtype=jnp.float32) * 0.1
        rmean = jax.random.normal(km, (O,), dtype=jnp.float32) * 0.1
        rvar = jnp.abs(jax.random.normal(kv, (O,), dtype=jnp.float32)) * 0.1 + 1.0
        # TODO(synk): PyTorch BatchNorm2d in train mode uses batch statistics;
        # here BN is applied in inference mode with the running stats above.

        return_nhwc = kw.get("return_nhwc", False)
        y = patch_merging_forward(x, weight, gamma, beta, rmean, rvar,
                                  k=k, stride=stride, **kw)
        y = jax.block_until_ready(y)

        y_ref = _reference(x, weight, gamma, beta, rmean, rvar, k=k, stride=stride)
        Ho = (H - k) // stride + 1
        Wo = (W - k) // stride + 1
        if return_nhwc:
            y_ref = jnp.transpose(y_ref, (0, 2, 3, 1))
            assert y.shape == (N, Ho, Wo, O), y.shape
        else:
            assert y.shape == (N, O, Ho, Wo), y.shape
        # bf16 operands (and default bf16 output) -> loosened tolerance vs the
        # f32 conv reference.
        yf = y.astype(jnp.float32)
        err = float(jnp.max(jnp.abs(yf - y_ref)))
        assert jnp.allclose(yf, y_ref, atol=1e-1, rtol=5e-2), err

    # small PatchMerging: N=2, dim=4, 16x16, k=stride=2, out_dim=8 (grid_m = 2)
    _check(2, 4, 16, 16, 2, 2, 8)
    # multi-tile M grid with a ragged (masked) last block, NHWC + f32 output path
    _check(2, 8, 48, 48, 2, 2, 16, tm=512, return_nhwc=True, out_dtype=jnp.float32)
    # K-tiled accumulator path (grid_k = 2)
    _check(2, 64, 16, 16, 2, 2, 32, force_k_tiling=True, tk=128)

    print("KERNEL_OK")
</pallas_src>

<mosaic_0001>
module attributes {stable_mosaic.version = 11 : i64} {
  func.func @_pm_kernel(%arg0: i32, %arg1: memref<64x16xbf16, #tpu.memory_space<vmem>>, %arg2: memref<16x128xbf16, #tpu.memory_space<vmem>>, %arg3: memref<1x128xf32, #tpu.memory_space<vmem>>, %arg4: memref<64x128xbf16, #tpu.memory_space<vmem>>) attributes {dimension_semantics = [#tpu.dimension_semantics<parallel>], iteration_bounds = array<i64: 2>, scalar_prefetch = 0 : i64, scratch_operands = 0 : i64, tpu.core_type = #tpu.core_type<tc>, window_params = [{transform_indices = @transform_0, window_bounds = array<i64: 64, 16>}, {pipeline_mode = #tpu.pipeline_mode<synchronous>, transform_indices = @transform_1, window_bounds = array<i64: 16, 128>}, {pipeline_mode = #tpu.pipeline_mode<synchronous>, transform_indices = @transform_2, window_bounds = array<i64: 1, 128>}, {transform_indices = @transform_3, window_bounds = array<i64: 64, 128>}]} {
    %c0 = arith.constant 0 : index
    %c0_0 = arith.constant 0 : index
    %0 = vector.load %arg1[%c0, %c0_0] : memref<64x16xbf16, #tpu.memory_space<vmem>>, vector<64x16xbf16>
    %c0_1 = arith.constant 0 : index
    %c0_2 = arith.constant 0 : index
    %1 = vector.load %arg2[%c0_1, %c0_2] : memref<16x128xbf16, #tpu.memory_space<vmem>>, vector<16x128xbf16>
    %cst = arith.constant dense<0.000000e+00> : vector<64x128xf32>
    %2 = tpu.matmul %0, %1, %cst {dimension_numbers = #tpu.dot_dimension_numbers<[1], [0], [0], [1], [0, 0, 1, 1], [], []>} : vector<64x16xbf16>, vector<16x128xbf16>, vector<64x128xf32> -> vector<64x128xf32>
    %c0_3 = arith.constant 0 : index
    %c0_4 = arith.constant 0 : index
    %3 = vector.load %arg3[%c0_3, %c0_4] : memref<1x128xf32, #tpu.memory_space<vmem>>, vector<1x128xf32>
    %4 = vector.broadcast %3 : vector<1x128xf32> to vector<64x128xf32>
    %5 = arith.addf %2, %4 : vector<64x128xf32>
    %6 = arith.truncf %5 : vector<64x128xf32> to vector<64x128xbf16>
    %c0_5 = arith.constant 0 : index
    %c0_6 = arith.constant 0 : index
    %7 = vector.load %arg4[%c0_5, %c0_6] : memref<64x128xbf16, #tpu.memory_space<vmem>>, vector<64x128xbf16>
    tpu.vector_store %arg4[%c0_5, %c0_6], %6 {strides = array<i32>} : memref<64x128xbf16, #tpu.memory_space<vmem>>, vector<64x128xbf16>,
    return
  }
  func.func @transform_0(%arg0: i32) -> (i32, i32) {
    %c0_i32 = arith.constant 0 : i32
    %c0_i32_0 = arith.constant 0 : i32
    return %arg0, %c0_i32 : i32, i32
  }
  func.func @transform_1(%arg0: i32) -> (i32, i32) {
    %c0_i32 = arith.constant 0 : i32
    %c0_i32_0 = arith.constant 0 : i32
    %c0_i32_1 = arith.constant 0 : i32
    return %c0_i32, %c0_i32_0 : i32, i32
  }
  func.func @transform_2(%arg0: i32) -> (i32, i32) {
    %c0_i32 = arith.constant 0 : i32
    %c0_i32_0 = arith.constant 0 : i32
    %c0_i32_1 = arith.constant 0 : i32
    return %c0_i32, %c0_i32_0 : i32, i32
  }
  func.func @transform_3(%arg0: i32) -> (i32, i32) {
    %c0_i32 = arith.constant 0 : i32
    %c0_i32_0 = arith.constant 0 : i32
    return %arg0, %c0_i32 : i32, i32
  }
}

</mosaic_0001>

<bundles_post_ra>
// kernel: tpu_custom_call.1
= control target key start
LH: loop header
LB: loop body
LE: loop exit
PB: predicated region body
PF: predicated region fallthrough
CT: control target
= control target key end

     0   :  { %8 = vsyncpa [#allocation3], 0  ;;  %s734_s0 = inlined_call_operand.vmem [shape: bf16[128,16], index: 0, kind: input, shape index: {}]   ;;  %s735_s1 = inlined_call_operand.vmem [shape: bf16[16,128], index: 1, kind: input, shape index: {}]   ;;  %s736_s2 = inlined_call_operand.vmem [shape: f32[1,128], index: 2, kind: input, shape index: {}]   ;;  %s737_s3 = inlined_call_operand.hbm [shape: bf16[128,128], index: 3, kind: output, shape index: {}]  }
   0x1   :  { %10 = vsyncpa [#allocation3 + $0x1], 0  ;;  %s622_s12 = smov 0   ;;  %s624_s13 = smov 0  }
   0x2   :  { %s626_s14 = smov 0   ;;  %s628_s15 = smov 0  }
   0x3 LB: > { %s643_s16 = sadd.s32 4294967295, %s597_s15   ;;  %s410_s17 = sadd.s32 4294967294, %s597_s15   ;;  %s597_s15 = sphi %s628_s15, %s743_s15   ;;  %s593_s14 = sphi %s626_s14, %s742_s14   ;;  %s589_s13 = sphi %s624_s13, %s741_s13   ;;  %s585_s12 = sphi %s622_s12, %s740_s12  }
   0x4   : > { %s647_s18 = sadd.s32 1, %s597_s15   ;;  %s91_s19 = sadd.s32 1, %s593_s14 }
   0x5   : > { %s88_s20 = ssub.s32 %s597_s15, %s647_s18  ;;  %p101_p0 = scmp.ne.s32.totalorder %s593_s14, %s589_s13 }
   0x6   : > { %p89_p1 = scmp.eq.s32.totalorder %s88_s20, 0  ;;  %p102_p2 = scmp.eq.s32.totalorder %s643_s16, 1 }
   0x7   : > { %p107_p3 = scmp.ne.s32.totalorder %s589_s13, %s585_s12  ;;  %p108_p4 = scmp.eq.s32.totalorder %s410_s17, 1 }
   0x8   : > { %s658_s21 = scalar_select %p89_p1, %s593_s14, %s91_s19  }
   0x9   : > { %p660_p5 = por %p102_p2, %p101_p0  ;;  %p664_p6 = por %p108_p4, %p107_p3 }
   0xa   : > { %p413_p7 = scmp.ge.s32.totalorder %s597_s15, 1  ;;  %p141_p8 = scmp.lt.s32.totalorder %s597_s15, 3 }
   0xc   : > { %p142_p9 = pnand %p413_p7, %p141_p8 }
   0xd   : > { %v530_v0 = vld [vmem:[%s735_s1] sm:$0xff] (!%p142_p9)   ;;  %s415_s26 = sshll.u32 (!%p142_p9), %s643_s16, 3  ;;  %vm216_vm0 = vcmask (!%p142_p9), 130048   ;;  %s162_s4 = sand.u32 (!%p142_p9), 1, %s589_s13  }
   0xe   : > { %145 = sbr.rel (%p142_p9) target bundleno = 260 (0x104), region = 32  ;;  %p166_p10 = scmp.lt.s32.totalorder (!%p142_p9), %s415_s26, 15  ;;  %477 = vmatprep.subr.bf16.mxu0 (!%p142_p9), %v530_v0  ;;  %487 = vmatprep.subr.bf16.mxu1 (!%p142_p9), %v530_v0  ;;  %v417_v6 = vld [vmem:[%s736_s2] ss:$0 sm:$0xff] (!%p142_p9) }
   0xf   : > { %478 = vmatpush3.bf16.msra.mxu0 (!%p142_p9), %v530_v0  ;;  %488 = vmatpush3.bf16.msra.mxu1 (!%p142_p9), %v530_v0  ;;  %s414_s5 = sshll.u32 (!%p142_p9), %s162_s4, 5  ;;  %s448_s10 = sshll.u32 (!%p142_p9), %s643_s16, 9 }
  0x10   : > { %s164_s8 = scalar_lea.vmem (!%p142_p9), [#allocation2], %s414_s5  ;;  %s689_s16 = scalar_lea.hbm (!%p142_p9), %s737_s3, %s448_s10 }
  0x11   : > { %s348_s9 = sshll.u32 (!%p142_p9), %s164_s8, 4  ;;  %s693_s19 = scalar_lea.sflag (!%p142_p9), [#allocation3], %s162_s4  ;;  %s684_s9 = int_to_ptr.vmem [resolvable:$true] %s348_s9 }
  0x12   : > { %s535_s20 = scalar_lea.vmem (!%p142_p9), %s684_s9, 512  ;;  %s599_s24 = smov (!%p142_p9), [#allocation2]  }
  0x13   : > { %p536_p11 = scmp.ne.s32.totalorder (!%p142_p9), %s684_s9, %s535_s20  ;;  %s539_s25 = sshll.u32 (!%p142_p9), %s599_s24, 4  ;;  %s540_s25 = int_to_ptr.vmem [resolvable:$false] %s539_s25 }
  0x14   : > { %p542_p0 = scmp.lt.s32.totalorder (!%p142_p9), %s684_s9, %s540_s25 }
  0x15   : > { %s745_s26 = smov (!%p166_p10, %s415_s26), 15  ;;  %p537_p12 = pnand %p536_p11, %p660_p5 }
  0x16   : > { %s416_s27 = sshll.u32 %s745_s26, 2  ;;  %s541_s26 = scalar_lea.vmem %s540_s25, 1024 }
  0x17   : > { %s169_s30 = scalar_lea.vmem %s734_s0, %s416_s27  ;;  %p538_p13 = pneg %p537_p12 }
  0x18   : > { %v531_v1 = vld [vmem:[%s169_s30] sm:$0xff]   ;;  %v532_v2 = vld [vmem:[%s169_s30 + $0x10] sm:$0xff]   ;;  %v533_v3 = vld [vmem:[%s169_s30 + $0x8] sm:$0xff]   ;;  %p543_p1 = scmp.lt.s32.totalorder %s541_s26, %s535_s20 }
  0x19   : > { %479 = vmatprep.mubr.msk.bf16.mxu0 %vm216_vm0, %v531_v1  ;;  %483 = vmatprep.mubr.msk.bf16.mxu1 %vm216_vm0, %v532_v2  ;;  %v534_v4 = vld [vmem:[%s169_s30 + $0x18] sm:$0xff]  }
  0x1a   : > { %480 = vmatmul.mubr.msk.bf16.vlgmr.msra.gmra.mrb[0].mxu0 %vm216_vm0, %v533_v3  ;;  %484 = vmatmul.mubr.msk.bf16.vlgmr.msra.gmra.mrb[0].mxu1 %vm216_vm0, %v534_v4  ;;  %p544_p2 = por %p543_p1, %p542_p0 }
  0x1c   : > { %p545_p3 = pnand %p544_p2, %p538_p13 }
  0xed   : > { %v481_v5 = vpop.f32.mrb[0].mxu0  ;;  %v485_v7 = vpop.f32.mrb[0].mxu1 }
  0xee   : > { %v263_v8 = vpop.f32.mrb[1].mxu0  ;;  %v279_v9 = vpop.f32.mrb[1].mxu1  ;;  %v272_v11 = vadd.f32 %v481_v5, %v417_v6  ;;  %v288_v15 = vadd.f32 %v485_v7, %v417_v6 }
  0xef   : > { %v482_v10 = vpop.f32.mrb[2].mxu0  ;;  %v486_v13 = vpop.f32.mrb[2].mxu1  ;;  %v264_v16 = vadd.f32 %v417_v6, %v263_v8  ;;  %v280_v20 = vadd.f32 %v417_v6, %v279_v9 }
  0xf0   : > { %v275_v12 = vadd.f32 %v482_v10, %v417_v6  ;;  %v266_v14 = vpop.f32.mrb[3].mxu0  ;;  %v291_v17 = vadd.f32 %v486_v13, %v417_v6  ;;  %v282_v19 = vpop.f32.mrb[3].mxu1 }
  0xf1   : > { %v267_v18 = vadd.f32 %v417_v6, %v266_v14  ;;  %v283_v22 = vadd.f32 %v417_v6, %v282_v19 }
  0xf2   : > { %v457_v21 = vpack.c.bf16 %v275_v12, %v272_v11  ;;  %v467_v23 = vpack.c.bf16 %v291_v17, %v288_v15 }
  0xf3   : > { %v452_v24 = vpack.c.bf16 %v267_v18, %v264_v16  ;;  %v462_v25 = vpack.c.bf16 %v283_v22, %v280_v20 }
  0xf4   : > { %469 = vst [vmem:[%s164_s8 + $0x8] sm:$0xff] %v457_v21   ;;  %471 = vst [vmem:[%s164_s8 + $0x18] sm:$0xff] %v467_v23  }
  0xf5   : > { %453 = vst [vmem:[%s164_s8] sm:$0xff] %v452_v24   ;;  %470 = vst [vmem:[%s164_s8 + $0x10] sm:$0xff] %v462_v25  }
  0xf6   : > { %548 = shalt.err (!%p545_p3)
}
  0xf7   : > { %s549_s27 = scalar_lea.hbm %s689_s16, 512  ;;  %s553_s30 = scalar_lea.hbm %s737_s3, 1024 }
  0xf8   : > { %p550_p4 = scmp.ne.s32.totalorder %s689_s16, %s549_s27  ;;  %p554_p9 = scmp.lt.u32.totalorder %s689_s16, %s737_s3 }
  0xf9   : > { %p555_p10 = scmp.lt.u32.totalorder %s553_s30, %s549_s27  ;;  %p557_p12 = scmp.lt.u32.totalorder %s549_s27, %s689_s16 }
  0xfa   : > { %p551_p7 = pnand %p550_p4, %p660_p5 }
  0xfb   : > { %p556_p11 = por %p555_p10, %p554_p9 }
  0xfc   : > { %p552_p8 = pneg %p551_p7 }
  0xfd   : > { %p558_p13 = por %p557_p12, %p556_p11 }
  0xff   : > { %p559_p0 = pnand %p558_p13, %p552_p8 }
 0x101   : > { %562 = shalt.err (!%p559_p0)
}
 0x102   : > { %s600_s6 = smov 64   ;;  %s601_s7 = smov 4  }
 0x103   : > { %489 = dma.vmem_to_hbm [thread:$0]  (%p660_p5), %s684_s9, 512, %s689_s16, %s693_s19, %s600_s6, %s600_s6, %s601_s7  }
 0x104 PF: > { %p495_p1 = scmp.ge.s32.totalorder %s597_s15, 2  ;;  %s363_s8 = sand.u32 1, %s585_s12  }
 0x105   : > { %s364_s10 = scalar_lea.sflag [#allocation3], %s363_s8 }
 0x106   : > { %p492_p2 = pnand %p495_p1, %p664_p6 }
 0x108   : > { %580 = dma.done.wait (!%p492_p2), %s364_s10, 512  }
 0x109   : > { %582 = vsyncadd (!%p492_p2), %s364_s10, 4294966784  ;;  %p13_p3 = scmp.ge.s32.totalorder %s647_s18, 4   ;;  %s740_s12 = smov %s589_s13 }
 0x10a   : > { %s741_s13 = smov %s593_s14  ;;  %s742_s14 = smov %s658_s21 }
 0x10b   : > { %s743_s15 = smov %s647_s18  ;;  %15 = sbr.rel (!%p13_p3) target bundleno = 3 (0x3), region = 67 }
 0x112   :  { %369 = vsyncpa [#allocation3], 1 }
 0x113   :  { %371 = vsyncpa [#allocation3 + $0x1], 1 }

</bundles_post_ra>
